<compile_context>
chip_gen: v6e
topology: v6e:2x2x1
jax: 0.10.0
libtpu: 0.0.40
codegen_flags: <defaults>
</compile_context>

<pallas_src>
import functools

import jax
import jax.numpy as jnp
from jax.experimental import pallas as pl
from jax.experimental.pallas import tpu as pltpu


# ----------------------------------------------------------------------------
# Fused single-pass kernel: pool + SE + scale for one batch element.
# x block: (1, C, HW)  ->  channels on sublanes, spatial on lanes.
# ----------------------------------------------------------------------------
def _ca_fused_kernel(x_ref, w1_ref, b1_ref, w2_ref, b2_ref, o_ref, *, inv_hw):
    x = x_ref[0]                                                      # (C, HW), input dtype
    # Global average pool over spatial (lane reduction), accumulate in f32.
    y = jnp.sum(x.astype(jnp.float32), axis=-1, keepdims=True) * inv_hw   # (C, 1)
    # 1x1 conv (C -> C//8) + bias + ReLU.
    h = jnp.dot(w1_ref[...], y, preferred_element_type=jnp.float32) + b1_ref[...]
    h = jnp.maximum(h, 0.0)                                           # (Cr, 1)
    # 1x1 conv (C//8 -> C) + bias + sigmoid.
    s = jnp.dot(w2_ref[...], h, preferred_element_type=jnp.float32) + b2_ref[...]
    s = jax.nn.sigmoid(s)                                             # (C, 1) f32
    # Channel-wise scale, broadcast across the HW lane axis; stay in input dtype.
    o_ref[0] = x * s.astype(x.dtype)


# ----------------------------------------------------------------------------
# Chunked path, kernel 1: accumulate the spatial sum over HW chunks, then
# compute the SE scale (C, 1) on the last chunk.
# ----------------------------------------------------------------------------
def _pool_se_kernel(x_ref, w1_ref, b1_ref, w2_ref, b2_ref, s_ref, acc_ref, *, inv_hw):
    k = pl.program_id(1)

    @pl.when(k == 0)
    def _():
        acc_ref[...] = jnp.zeros_like(acc_ref)

    acc_ref[...] += jnp.sum(x_ref[0].astype(jnp.float32), axis=-1, keepdims=True)

    @pl.when(k == pl.num_programs(1) - 1)
    def _():
        y = acc_ref[...] * inv_hw                                     # (C, 1)
        h = jnp.dot(w1_ref[...], y, preferred_element_type=jnp.float32) + b1_ref[...]
        h = jnp.maximum(h, 0.0)                                       # (Cr, 1)
        s = jnp.dot(w2_ref[...], h, preferred_element_type=jnp.float32) + b2_ref[...]
        s_ref[0] = jax.nn.sigmoid(s)                                  # (C, 1) f32


# ----------------------------------------------------------------------------
# Chunked path, kernel 2: re-stream HW chunks and apply the channel scale.
# ----------------------------------------------------------------------------
def _scale_kernel(x_ref, s_ref, o_ref):
    x = x_ref[0]                                                      # (C, chunk)
    o_ref[0] = x * s_ref[0].astype(x.dtype)                           # broadcast (C,1) over lanes


def ca_layer(x_nchw, w1, b1, w2, b2, *, force_chunked=False, chunk_lanes=None):
    """x_nchw: (B, C, H, W); w1: (C//8, C, 1, 1); b1: (C//8,);
    w2: (C, C//8, 1, 1); b2: (C,). Returns (B, C, H, W)."""
    B, C, H, W = x_nchw.shape
    Cr = w1.shape[0]
    HW = H * W

    # NCHW-native view: free reshape (contiguous), no transpose.
    x = x_nchw.reshape(B, C, HW)
    w1m = w1.reshape(Cr, C)          # (Cr, C): h = W1 @ y
    w2m = w2.reshape(C, Cr)          # (C, Cr): s = W2 @ h
    b1m = b1.reshape(Cr, 1)
    b2m = b2.reshape(C, 1)
    inv_hw = 1.0 / float(HW)

    itemsize = x.dtype.itemsize
    block_bytes = C * HW * itemsize                # one (C, HW) tile of x

    # Use the fused single-pass kernel while the double-buffered x + out working
    # set stays comfortably inside VMEM (binding constraint: v7x 64 MiB).
    FUSED_BLOCK_LIMIT = 8 * 1024 * 1024            # ~8 MiB per block -> ~32 MiB resident
    can_chunk = (HW % 128 == 0)                    # lane tiling needs multiples of 128
    use_chunked = (force_chunked or block_bytes > FUSED_BLOCK_LIMIT) and can_chunk
    # NOTE: if HW is not a multiple of 128 we keep the single-pass kernel and
    # just raise the scoped VMEM limit (full-dim blocks are always legal).

    if not use_chunked:
        vmem_limit = int(min(max(4 * block_bytes + (2 << 20), 32 << 20), 56 << 20))
        out = pl.pallas_call(
            functools.partial(_ca_fused_kernel, inv_hw=inv_hw),
            out_shape=jax.ShapeDtypeStruct((B, C, HW), x.dtype),
            grid_spec=pltpu.PrefetchScalarGridSpec(
                num_scalar_prefetch=0,
                grid=(B,),
                in_specs=[
                    pl.BlockSpec((1, C, HW), lambda b: (b, 0, 0)),
                    pl.BlockSpec((Cr, C), lambda b: (0, 0)),
                    pl.BlockSpec((Cr, 1), lambda b: (0, 0)),
                    pl.BlockSpec((C, Cr), lambda b: (0, 0)),
                    pl.BlockSpec((C, 1), lambda b: (0, 0)),
                ],
                out_specs=pl.BlockSpec((1, C, HW), lambda b: (b, 0, 0)),
            ),
            compiler_params=pltpu.CompilerParams(
                dimension_semantics=("parallel",),
                vmem_limit_bytes=vmem_limit),
        )(x, w1m, b1m, w2m, b2m)
        return out.reshape(B, C, H, W)

    # ---------------- Chunked (large feature map) path ----------------
    if chunk_lanes is None:
        target_chunk_bytes = 4 << 20               # large chunks; grid overhead ~0.35us/step
        max_lanes = max(128, ((target_chunk_bytes // (C * itemsize)) // 128) * 128)
        chunk = 128
        for cand in range(128, min(max_lanes, HW) + 1, 128):
            if HW % cand == 0:
                chunk = cand
    else:
        chunk = int(chunk_lanes)
    assert HW % chunk == 0 and chunk % 128 == 0
    n_chunks = HW // chunk

    # Pass 1: pooled sum over HW chunks -> SE scale s: (B, C, 1) f32.
    s = pl.pallas_call(
        functools.partial(_pool_se_kernel, inv_hw=inv_hw),
        out_shape=jax.ShapeDtypeStruct((B, C, 1), jnp.float32),
        grid_spec=pltpu.PrefetchScalarGridSpec(
            num_scalar_prefetch=0,
            grid=(B, n_chunks),
            in_specs=[
                pl.BlockSpec((1, C, chunk), lambda b, k: (b, 0, k)),
                pl.BlockSpec((Cr, C), lambda b, k: (0, 0)),
                pl.BlockSpec((Cr, 1), lambda b, k: (0, 0)),
                pl.BlockSpec((C, Cr), lambda b, k: (0, 0)),
                pl.BlockSpec((C, 1), lambda b, k: (0, 0)),
            ],
            out_specs=pl.BlockSpec((1, C, 1), lambda b, k: (b, 0, 0)),
            scratch_shapes=[pltpu.VMEM((C, 1), jnp.float32)],
        ),
        compiler_params=pltpu.CompilerParams(
            dimension_semantics=("parallel", "arbitrary")),
    )(x, w1m, b1m, w2m, b2m)

    # Pass 2: re-stream HW chunks and apply the channel scale.
    out = pl.pallas_call(
        _scale_kernel,
        out_shape=jax.ShapeDtypeStruct((B, C, HW), x.dtype),
        grid_spec=pltpu.PrefetchScalarGridSpec(
            num_scalar_prefetch=0,
            grid=(B, n_chunks),
            in_specs=[
                pl.BlockSpec((1, C, chunk), lambda b, k: (b, 0, k)),
                pl.BlockSpec((1, C, 1), lambda b, k: (b, 0, 0)),
            ],
            out_specs=pl.BlockSpec((1, C, chunk), lambda b, k: (b, 0, k)),
        ),
        compiler_params=pltpu.CompilerParams(
            dimension_semantics=("parallel", "parallel")),
    )(x, s)
    return out.reshape(B, C, H, W)


def _reference(x, w1, b1, w2, b2):
    # Pure-JAX reference of the PyTorch forward (NCHW).
    B, C, H, W = x.shape
    Cr = w1.shape[0]
    y = jnp.mean(x, axis=(2, 3), keepdims=True)                       # (B, C, 1, 1)
    y = jnp.einsum('bcij,oc->boij', y, w1.reshape(Cr, C)) + b1.reshape(1, Cr, 1, 1)
    y = jnp.maximum(y, 0.0)
    y = jnp.einsum('bcij,oc->boij', y, w2.reshape(C, Cr)) + b2.reshape(1, C, 1, 1)
    y = jax.nn.sigmoid(y)
    return x * y


if __name__ == "__main__":
    # channel must be divisible by 8 so channel // 8 >= 1
    B, C, H, W = 2, 32, 16, 16
    Cr = C // 8

    key = jax.random.PRNGKey(0)
    kx, k1, k2, k3, k4 = jax.random.split(key, 5)
    x = jax.random.normal(kx, (B, C, H, W), dtype=jnp.float32)
    # Conv2d weight shapes: (out, in, 1, 1).
    w1 = jax.random.normal(k1, (Cr, C, 1, 1), dtype=jnp.float32) * 0.1
    b1 = jax.random.normal(k2, (Cr,), dtype=jnp.float32) * 0.1
    w2 = jax.random.normal(k3, (C, Cr, 1, 1), dtype=jnp.float32) * 0.1
    b2 = jax.random.normal(k4, (C,), dtype=jnp.float32) * 0.1

    ref = _reference(x, w1, b1, w2, b2)

    # Fused single-pass path (default for small/medium feature maps).
    out_fused = jax.block_until_ready(ca_layer(x, w1, b1, w2, b2))
    assert out_fused.shape == (B, C, H, W)
    assert jnp.allclose(out_fused, ref, atol=1e-5, rtol=1e-5), "fused path mismatch"

    # Exercise the chunked (large-feature-map) path on small shapes as well.
    out_chunked = jax.block_until_ready(
        ca_layer(x, w1, b1, w2, b2, force_chunked=True, chunk_lanes=128))
    assert jnp.allclose(out_chunked, ref, atol=1e-5, rtol=1e-5), "chunked path mismatch"

    print("KERNEL_OK")
</pallas_src>

<mosaic_0001>
module attributes {stable_mosaic.version = 11 : i64} {
  func.func @_ca_fused_kernel(%arg0: i32, %arg1: memref<1x32x256xf32, #tpu.memory_space<vmem>>, %arg2: memref<4x32xf32, #tpu.memory_space<vmem>>, %arg3: memref<4x1xf32, #tpu.memory_space<vmem>>, %arg4: memref<32x4xf32, #tpu.memory_space<vmem>>, %arg5: memref<32x1xf32, #tpu.memory_space<vmem>>, %arg6: memref<1x32x256xf32, #tpu.memory_space<vmem>>) attributes {dimension_semantics = [#tpu.dimension_semantics<parallel>], iteration_bounds = array<i64: 2>, scalar_prefetch = 0 : i64, scratch_operands = 0 : i64, tpu.core_type = #tpu.core_type<tc>, window_params = [{transform_indices = @transform_0, window_bounds = array<i64: 1, 32, 256>}, {pipeline_mode = #tpu.pipeline_mode<synchronous>, transform_indices = @transform_1, window_bounds = array<i64: 4, 32>}, {pipeline_mode = #tpu.pipeline_mode<synchronous>, transform_indices = @transform_2, window_bounds = array<i64: 4, 1>}, {pipeline_mode = #tpu.pipeline_mode<synchronous>, transform_indices = @transform_3, window_bounds = array<i64: 32, 4>}, {pipeline_mode = #tpu.pipeline_mode<synchronous>, transform_indices = @transform_4, window_bounds = array<i64: 32, 1>}, {transform_indices = @transform_5, window_bounds = array<i64: 1, 32, 256>}]} {
    %c0 = arith.constant 0 : index
    %c0_0 = arith.constant 0 : index
    %c0_1 = arith.constant 0 : index
    %0 = vector.load %arg1[%c0, %c0_0, %c0_1] : memref<1x32x256xf32, #tpu.memory_space<vmem>>, vector<1x32x256xf32>
    %1 = vector.shape_cast %0 : vector<1x32x256xf32> to vector<32x256xf32>
    %cst = arith.constant dense<0.000000e+00> : vector<32xf32>
    %2 = vector.multi_reduction <add>, %1, %cst [1] : vector<32x256xf32> to vector<32xf32>
    %3 = vector.shape_cast %2 : vector<32xf32> to vector<32x1xf32>
    %cst_2 = arith.constant 3.906250e-03 : f32
    %4 = vector.broadcast %cst_2 : f32 to vector<32x1xf32>
    %5 = arith.mulf %3, %4 : vector<32x1xf32>
    %c0_3 = arith.constant 0 : index
    %c0_4 = arith.constant 0 : index
    %6 = vector.load %arg2[%c0_3, %c0_4] : memref<4x32xf32, #tpu.memory_space<vmem>>, vector<4x32xf32>
    %cst_5 = arith.constant dense<0.000000e+00> : vector<4x1xf32>
    %7 = tpu.matmul %6, %5, %cst_5 {dimension_numbers = #tpu.dot_dimension_numbers<[1], [0], [0], [1], [0, 0, 1, 1], [], []>} : vector<4x32xf32>, vector<32x1xf32>, vector<4x1xf32> -> vector<4x1xf32>
    %c0_6 = arith.constant 0 : index
    %c0_7 = arith.constant 0 : index
    %8 = vector.load %arg3[%c0_6, %c0_7] : memref<4x1xf32, #tpu.memory_space<vmem>>, vector<4x1xf32>
    %9 = arith.addf %7, %8 : vector<4x1xf32>
    %cst_8 = arith.constant 0.000000e+00 : f32
    %10 = vector.broadcast %cst_8 : f32 to vector<4x1xf32>
    %11 = arith.maximumf %9, %10 : vector<4x1xf32>
    %c0_9 = arith.constant 0 : index
    %c0_10 = arith.constant 0 : index
    %12 = vector.load %arg4[%c0_9, %c0_10] : memref<32x4xf32, #tpu.memory_space<vmem>>, vector<32x4xf32>
    %cst_11 = arith.constant dense<0.000000e+00> : vector<32x1xf32>
    %13 = tpu.matmul %12, %11, %cst_11 {dimension_numbers = #tpu.dot_dimension_numbers<[1], [0], [0], [1], [0, 0, 1, 1], [], []>} : vector<32x4xf32>, vector<4x1xf32>, vector<32x1xf32> -> vector<32x1xf32>
    %c0_12 = arith.constant 0 : index
    %c0_13 = arith.constant 0 : index
    %14 = vector.load %arg5[%c0_12, %c0_13] : memref<32x1xf32, #tpu.memory_space<vmem>>, vector<32x1xf32>
    %15 = arith.addf %13, %14 : vector<32x1xf32>
    %16 = arith.negf %15 : vector<32x1xf32>
    %17 = math.exp %16 : vector<32x1xf32>
    %cst_14 = arith.constant 1.000000e+00 : f32
    %18 = vector.broadcast %cst_14 : f32 to vector<32x1xf32>
    %19 = arith.addf %18, %17 : vector<32x1xf32>
    %20 = arith.divf %18, %19 : vector<32x1xf32>
    %21 = vector.broadcast %20 : vector<32x1xf32> to vector<32x256xf32>
    %22 = arith.mulf %1, %21 : vector<32x256xf32>
    %c0_15 = arith.constant 0 : index
    %c0_16 = arith.constant 0 : index
    %c0_17 = arith.constant 0 : index
    %23 = vector.load %arg6[%c0_15, %c0_16, %c0_17] : memref<1x32x256xf32, #tpu.memory_space<vmem>>, vector<1x32x256xf32>
    %24 = vector.shape_cast %23 : vector<1x32x256xf32> to vector<32x256xf32>
    %25 = vector.shape_cast %22 : vector<32x256xf32> to vector<1x32x256xf32>
    tpu.vector_store %arg6[%c0_15, %c0_16, %c0_17], %25 {strides = array<i32>} : memref<1x32x256xf32, #tpu.memory_space<vmem>>, vector<1x32x256xf32>,
    return
  }
  func.func @transform_0(%arg0: i32) -> (i32, i32, i32) {
    %c0_i32 = arith.constant 0 : i32
    %c0_i32_0 = arith.constant 0 : i32
    %c0_i32_1 = arith.constant 0 : i32
    return %arg0, %c0_i32, %c0_i32_0 : i32, i32, i32
  }
  func.func @transform_1(%arg0: i32) -> (i32, i32) {
    %c0_i32 = arith.constant 0 : i32
    %c0_i32_0 = arith.constant 0 : i32
    %c0_i32_1 = arith.constant 0 : i32
    return %c0_i32, %c0_i32_0 : i32, i32
  }
  func.func @transform_2(%arg0: i32) -> (i32, i32) {
    %c0_i32 = arith.constant 0 : i32
    %c0_i32_0 = arith.constant 0 : i32
    %c0_i32_1 = arith.constant 0 : i32
    return %c0_i32, %c0_i32_0 : i32, i32
  }
  func.func @transform_3(%arg0: i32) -> (i32, i32) {
    %c0_i32 = arith.constant 0 : i32
    %c0_i32_0 = arith.constant 0 : i32
    %c0_i32_1 = arith.constant 0 : i32
    return %c0_i32, %c0_i32_0 : i32, i32
  }
  func.func @transform_4(%arg0: i32) -> (i32, i32) {
    %c0_i32 = arith.constant 0 : i32
    %c0_i32_0 = arith.constant 0 : i32
    %c0_i32_1 = arith.constant 0 : i32
    return %c0_i32, %c0_i32_0 : i32, i32
  }
  func.func @transform_5(%arg0: i32) -> (i32, i32, i32) {
    %c0_i32 = arith.constant 0 : i32
    %c0_i32_0 = arith.constant 0 : i32
    %c0_i32_1 = arith.constant 0 : i32
    return %arg0, %c0_i32, %c0_i32_0 : i32, i32, i32
  }
}

</mosaic_0001>

<bundles_post_ra>
// kernel: tpu_custom_call.1
= control target key start
LH: loop header
LB: loop body
LE: loop exit
PB: predicated region body
PF: predicated region fallthrough
CT: control target
= control target key end

     0   :  { %10 = vsyncpa [#allocation3], 0  ;;  %s1080_s0 = inlined_call_operand.hbm [shape: f32[2,32,256], index: 0, kind: input, shape index: {}]   ;;  %s1081_s1 = inlined_call_operand.vmem [shape: f32[4,32], index: 1, kind: input, shape index: {}]   ;;  %s1082_s2 = inlined_call_operand.vmem [shape: f32[4,1], index: 2, kind: input, shape index: {}]   ;;  %s1083_s3 = inlined_call_operand.vmem [shape: f32[32,4], index: 3, kind: input, shape index: {}]   ;;  %s1084_s4 = inlined_call_operand.vmem [shape: f32[32,1], index: 4, kind: input, shape index: {}]   ;;  %s1085_s5 = inlined_call_operand.hbm [shape: f32[2,32,256], index: 5, kind: output, shape index: {}]  }
   0x1   :  { %12 = vsyncpa [#allocation3 + $0x1], 0 }
   0x2   :  { %13 = vsyncpa [#allocation4], 0 }
   0x3   :  { %15 = vsyncpa [#allocation4 + $0x1], 0  ;;  %s860_s18 = smov 0   ;;  %s862_s19 = smov 0  }
   0x4   :  { %s864_s20 = smov 0   ;;  %s866_s21 = smov 0  }
   0x5 LB: > { %s881_s22 = sadd.s32 4294967295, %s819_s21   ;;  %s601_s23 = sadd.s32 4294967294, %s819_s21   ;;  %s819_s21 = sphi %s866_s21, %s1100_s21   ;;  %s815_s20 = sphi %s864_s20, %s1099_s20   ;;  %s811_s19 = sphi %s862_s19, %s1098_s19   ;;  %s807_s18 = sphi %s860_s18, %s1097_s18  }
   0x6   : > { %s885_s24 = sadd.s32 1, %s819_s21   ;;  %s28_s25 = sadd.s32 1, %s815_s20 }
   0x7   : > { %s25_s26 = ssub.s32 %s819_s21, %s885_s24  ;;  %p35_p0 = scmp.ne.s32.totalorder %s815_s20, %s811_s19 }
   0x8   : > { %p26_p1 = scmp.eq.s32.totalorder %s25_s26, 0  ;;  %p36_p2 = scmp.eq.s32.totalorder %s819_s21, 0 }
   0x9   : > { %p41_p3 = scmp.ne.s32.totalorder %s811_s19, %s807_s18  ;;  %p42_p4 = scmp.eq.s32.totalorder %s881_s22, 0 }
   0xa   : > { %s897_s27 = scalar_select %p26_p1, %s815_s20, %s28_s25  }
   0xb   : > { %p899_p5 = por %p36_p2, %p35_p0  ;;  %p903_p6 = por %p42_p4, %p41_p3 }
   0xc   : > { %p149_p7 = scmp.eq.s32.totalorder %s881_s22, 1  ;;  %p155_p8 = scmp.eq.s32.totalorder %s601_s23, 1 }
   0xd   : > { %s1089_s29 = scalar_select %p903_p6, 1, 0 }
   0xe   : > { %p668_p10 = scmp.lt.s32.totalorder %s819_s21, 2  ;;  %p910_p11 = por %p149_p7, %p35_p0 }
   0xf   : > { %p914_p12 = por %p155_p8, %p41_p3  ;;  %s187_s7 = sand.u32 1, %s815_s20  }
  0x10   : > { %s1090_s30 = scalar_select %p910_p11, 1, 0 }
  0x11   : > { %s1091_s6 = scalar_select %p914_p12, 1, 0 }
  0x12   : > { %s625_s8 = sshll.u32 %s819_s21, 10  ;;  %s604_s9 = sshll.u32 %s187_s7, 6 }
  0x13   : > { %s923_s12 = scalar_lea.hbm %s1080_s0, %s625_s8  ;;  %s191_s13 = scalar_lea.vmem [#allocation2], %s604_s9 }
  0x14   : > { %s198_s14 = sshll.u32 %s191_s13, 4  ;;  %p927_p13 = pnand %p668_p10, %p899_p5  ;;  %s931_s14 = int_to_ptr.vmem [resolvable:$true] %s198_s14 }
  0x15   : > { %s933_s16 = scalar_lea.sflag [#allocation3], %s187_s7  ;;  %s727_s17 = scalar_lea.hbm %s923_s12, 1024 }
  0x16   : > { %p728_p0 = scmp.ne.s32.totalorder %s923_s12, %s727_s17  ;;  %p729_p1 = pneg %p927_p13 }
  0x17   : > { %s732_s26 = scalar_lea.hbm %s1080_s0, 2048  ;;  %p733_p4 = scmp.lt.s32.totalorder %s923_s12, %s1080_s0 }
  0x18   : > { %p730_p2 = pnand %p729_p1, %p728_p0  ;;  %p734_p5 = scmp.lt.s32.totalorder %s732_s26, %s727_s17 }
  0x1a   : > { %p731_p3 = pneg %p730_p2  ;;  %p735_p7 = por %p734_p5, %p733_p4 }
  0x1c   : > { %p736_p8 = pnand %p735_p7, %p731_p3 }
  0x1e   : > { %739 = shalt.err (!%p736_p8)
}
  0x1f   : > { %s740_s7 = scalar_lea.vmem %s931_s14, 1024  ;;  %s821_s9 = smov [#allocation2]  }
  0x20   : > { %p741_p10 = scmp.ne.s32.totalorder %s931_s14, %s740_s7  ;;  %s745_s10 = sshll.u32 %s821_s9, 4  ;;  %s746_s10 = int_to_ptr.vmem [resolvable:$false] %s745_s10 }
  0x21   : > { %s747_s11 = scalar_lea.vmem %s746_s10, 2048  ;;  %p748_p2 = scmp.lt.s32.totalorder %s931_s14, %s746_s10 }
  0x22   : > { %p743_p9 = pnand %p741_p10, %p729_p1  ;;  %p749_p12 = scmp.lt.s32.totalorder %s747_s11, %s740_s7 }
  0x24   : > { %p744_p0 = pneg %p743_p9  ;;  %p750_p11 = por %p749_p12, %p748_p2 }
  0x26   : > { %p751_p6 = pnand %p750_p11, %p744_p0 }
  0x28   : > { %754 = shalt.err (!%p751_p6)
}
  0x29   : > { %s822_s13 = smov 256   ;;  %s823_s17 = smov 16  }
  0x2a   : > { %663 = dma.hbm_to_vmem [thread:$0]  (!%p927_p13), %s923_s12, 1024, %s931_s14, %s933_s16, %s822_s13, %s822_s13, %s823_s17  }
  0x2b   : > { %p607_p9 = scmp.ge.s32.totalorder %s819_s21, 1  ;;  %p206_p1 = scmp.lt.s32.totalorder %s819_s21, 3 }
  0x2d   : > { %p207_p3 = pnand %p607_p9, %p206_p1 }
  0x2e   : > { %s957_s23 = sand.u32 (!%p207_p3), 1, %s811_s19   ;;  %p1093_p6 = scmp.ne.s32.totalorder (!%p207_p3), %s1089_s29, 0 }
  0x2f   : > { %210 = sbr.rel (%p207_p3) target bundleno = 781 (0x30d), region = 40  ;;  %s608_s25 = sshll.u32 (!%p207_p3), %s957_s23, 6 }
  0x30   : > { %s213_s26 = scalar_lea.sflag (!%p207_p3), [#allocation3], %s957_s23  ;;  %s216_s28 = scalar_lea.vmem (!%p207_p3), [#allocation2], %s608_s25 }
  0x34   : > { %798 = dma.done.wait (%p1093_p6), %s213_s26, 1024  }
  0x35   : > { %800 = vsyncadd (%p1093_p6), %s213_s26, 4294966272  ;;  %v967_v0 = vld [vmem:[%s216_s28 + $0x30] sm:$0xff]  ;;  %v969_v1 = vld [vmem:[%s216_s28 + $0x38] sm:$0xff]  ;;  %v824_v12 = vmov 0.0   ;;  %vm825_vm0 = vmmov 0   ;;  %vm269_vm1 = vcmask 261120  }
  0x36   : > { %v971_v2 = vld [vmem:[%s216_s28 + $0x20] sm:$0xff]  ;;  %v260_v3 = vadd.f32 %v969_v1, %v967_v0  ;;  %v975_v4 = vld [vmem:[%s216_s28 + $0x28] sm:$0xff]  ;;  %v977_v5 = vld [vmem:[%s216_s28 + $0x10] sm:$0xff]  ;;  %637 = vmatprep.subr.mxu0 %v824_v12  ;;  %645 = vmatprep.mubr.msk.f32.mxu0 %vm825_vm0, %v824_v12  ;;  %vm352_vm2 = vcmask 31744   ;;  %vm365_vm3 = vcmask 1043456   ;;  %v826_v31 = vmov 0  }
  0x37   : > { %v979_v6 = vld [vmem:[%s216_s28 + $0x18] sm:$0xff]  ;;  %v983_v8 = vld [vmem:[%s216_s28] sm:$0xff]  ;;  %v985_v9 = vld [vmem:[%s216_s28 + $0x8] sm:$0xff]  ;;  %v257_v10 = vadd.f32 %v975_v4, %v971_v2  ;;  %710 = vset.pattern.permute.xlu1 %v826_v31  ;;  %709 = vset.pattern.permute.xlu0 %v826_v31  ;;  %s242_s7 = scalar_lea.vmem [#allocation5], %s608_s25  ;;  %s626_s10 = sshll.u32 %s881_s22, 10 }
  0x38   : > { %v254_v7 = vadd.f32 %v979_v6, %v977_v5  ;;  %261 = vadd.xlane.f32.xlu0 %v260_v3  ;;  %v251_v11 = vadd.f32 %v985_v9, %v983_v8  ;;  %v267_v21 = vld [vmem:[%s1081_s1] sm:$0xf]  ;;  %v345_v28 = vld [vmem:[%s1083_s3 + $0x8] sm:$0xff]  ;;  %v346_v29 = vld [vmem:[%s1083_s3 + $0x10] sm:$0xff]  ;;  %s528_s9 = sshll.u32 %s242_s7, 4  ;;  %s1035_s13 = scalar_lea.hbm %s1085_s5, %s626_s10  ;;  %s1030_s9 = int_to_ptr.vmem [resolvable:$true] %s528_s9 }
  0x39   : > { %v344_v22 = vld [vmem:[%s1083_s3] sm:$0xff]  ;;  %v347_v30 = vld [vmem:[%s1083_s3 + $0x18] sm:$0xff]  ;;  %v349_v32 = vld [vmem:[%s1084_s4 + $0x8] sm:$0xff]  ;;  %s515_s22 = scalar_lea.sflag [#allocation4], %s957_s23  ;;  %s755_s17 = scalar_lea.vmem %s1030_s9, 1024 }
  0x3a   : > { %255 = vadd.xlane.f32.xlu1 %v254_v7  ;;  %650 = vmatprep.mubr.msk.f32.mxu1 %vm352_vm2, %v344_v22  ;;  %v268_v23 = vld [vmem:[%s1082_s2] sm:$0xf]  ;;  %v351_v37 = vld [vmem:[%s1084_s4 + $0x18] sm:$0xff]  ;;  %v350_v41 = vld [vmem:[%s1084_s4 + $0x10] sm:$0xff]  ;;  %p756_p11 = scmp.ne.s32.totalorder %s1030_s9, %s755_s17  ;;  %p1094_p12 = scmp.ne.s32.totalorder %s1090_s30, 0 }
  0x3b   : > { %v348_v34 = vld [vmem:[%s1084_s4] sm:$0xff]  ;;  %s827_s26 = smov [#allocation5]  }
  0x3c   : > { %258 = vadd.xlane.f32.xlu0 %v257_v10  ;;  %p757_p13 = pnand %p756_p11, %p1094_p12  ;;  %s759_s28 = sshll.u32 %s827_s26, 4  ;;  %s760_s28 = int_to_ptr.vmem [resolvable:$false] %s759_s28 }
  0x3d   : > { %s761_s29 = scalar_lea.vmem %s760_s28, 2048  ;;  %p762_p5 = scmp.lt.s32.totalorder %s1030_s9, %s760_s28 }
  0x3e   : > { %252 = vadd.xlane.f32.xlu1 %v251_v11  ;;  %p758_p4 = pneg %p757_p13  ;;  %p763_p7 = scmp.lt.s32.totalorder %s761_s29, %s755_s17 }
  0x40   : > { %p764_p8 = por %p763_p7, %p762_p5 }
  0x42   : > { %p765_p10 = pnand %p764_p8, %p758_p4 }
  0xc1   : > { %v262_v13 = vpop.xlane.xlu0 %261 }
  0xc2   : > { %v266_v14 = vmul.f32 0.00390625, %v262_v13 }
  0xc3   : > { %v256_v15 = vpop.xlane.xlu1 %255 }
  0xc4   : > { %638 = vmatpush3.msra.mxu0 %v266_v14  ;;  %v264_v19 = vmul.f32 0.00390625, %v256_v15 }
  0xc5   : > { %v259_v16 = vpop.xlane.xlu0 %258  ;;  %639 = vmatprep.subr.mxu0 %v824_v12 }
  0xc6   : > { %v265_v17 = vmul.f32 0.00390625, %v259_v16 }
  0xc7   : > { %v253_v18 = vpop.xlane.xlu1 %252 }
  0xc8   : > { %640 = vmatpush3.msra.mxu0 %v265_v17  ;;  %v263_v20 = vmul.f32 0.00390625, %v253_v18 }
  0xc9   : > { %641 = vmatprep.subr.mxu0 %v824_v12 }
  0xca   : > { %642 = vmatpush3.msra.mxu0 %v264_v19 }
  0xcb   : > { %643 = vmatprep.subr.mxu0 %v824_v12 }
  0xcc   : > { %644 = vmatpush3.msra.mxu0 %v263_v20 }
  0xcd   : > { %646 = vmatmul.mubr.msk.f32.vlgmr.msra.gmra.mxu0 %vm269_vm1, %v267_v21 }
 0x18d   : > { %v339_v24 = vpop.f32.mrf.mxu0 }
 0x18e   : > { %v340_v25 = vadd.f32 %v339_v24, %v268_v23 }
 0x18f   : > { %v647_v26 = vpop.f32.mrf.mxu0 }
 0x190   : > { %v343_v27 = vmax.f32 %v340_v25, 0.0 }
 0x192   : > { %648 = vmatprep.subr.msk.mxu1 %vm365_vm3, %v343_v27 }
 0x193   : > { %649 = vmatpush3.msk.msra.mxu1 %vm365_vm3, %v343_v27 }
 0x194   : > { %651 = vmatmul.mubr.msk.f32.vlgmr.msra.gmra.mxu1 %vm352_vm2, %v345_v28 }
 0x195   : > { %653 = vmatprep.mubr.msk.f32.mxu1 %vm352_vm2, %v346_v29 }
 0x198   : > { %654 = vmatmul.mubr.msk.f32.gmra.mxu1 %vm352_vm2, %v347_v30 }
 0x254   : > { %v652_v33 = vpop.f32.mrf.mxu1 }
 0x255   : > { %v441_v35 = vadd.f32 %v652_v33, %v349_v32 }
 0x256   : > { %v435_v36 = vpop.f32.mrf.mxu1 }
 0x257   : > { %v617_v38 = vmul.f32 -1.442695, %v441_v35  ;;  %v436_v39 = vadd.f32 %v435_v36, %v348_v34 }
 0x258   : > { %v655_v40 = vpop.f32.mrf.mxu1 }
 0x259   : > { %711 = vpow2.f32 %v617_v38  ;;  %v616_v42 = vmul.f32 -1.442695, %v436_v39  ;;  %v451_v43 = vadd.f32 %v655_v40, %v351_v37 }
 0x25a   : > { %v445_v44 = vpop.f32.mrf.mxu1 }
 0x25b   : > { %713 = vpow2.f32 %v616_v42  ;;  %v619_v45 = vmul.f32 -1.442695, %v451_v43  ;;  %v446_v46 = vadd.f32 %v445_v44, %v350_v41 }
 0x25d   : > { %v618_v47 = vmul.f32 -1.442695, %v446_v46  ;;  %715 = vpow2.f32 %v619_v45 }
 0x25f   : > { %717 = vpow2.f32 %v618_v47 }
 0x266   : > { %v712_v48 = vpop.eup %711 }
 0x267   : > { %v467_v49 = vadd.f32 1.0, %v712_v48 }
 0x268   : > { %v714_v50 = vpop.eup %713 }
 0x269   : > { %719 = vrcp.f32 %v467_v49  ;;  %v466_v51 = vadd.f32 1.0, %v714_v50 }
 0x26a   : > { %v716_v52 = vpop.eup %715 }
 0x26b   : > { %721 = vrcp.f32 %v466_v51  ;;  %v469_v55 = vadd.f32 1.0, %v716_v52 }
 0x26c   : > { %v718_v53 = vpop.eup %717 }
 0x26d   : > { %v468_v54 = vadd.f32 1.0, %v718_v53 }
 0x26f   : > { %723 = vrcp.f32 %v468_v54 }
 0x270   : > { %725 = vrcp.f32 %v469_v55 }
 0x276   : > { %v720_v56 = vpop.eup %719 }
 0x277   : > { %485 = vperm.xlu1 %710, %v720_v56  }
 0x278   : > { %v722_v57 = vpop.eup %721 }
 0x279   : > { %480 = vperm.xlu0 %709, %v722_v57  }
 0x27c   : > { %v724_v58 = vpop.eup %723 }
 0x27d   : > { %490 = vperm.xlu1 %710, %v724_v58   ;;  %v726_v59 = vpop.eup %725 }
 0x281   : > { %495 = vperm.xlu1 %710, %v726_v59  }
 0x2f2   : > { %v486_v60 = vpop.permute.xlu1 %485 }
 0x2f3   : > { %v500_v61 = vmul.f32 %v486_v60, %v977_v5  ;;  %v501_v62 = vmul.f32 %v486_v60, %v979_v6 }
 0x2f4   : > { %v481_v63 = vpop.permute.xlu0 %480 }
 0x2f5   : > { %508 = vst [vmem:[%s242_s7 + $0x10] sm:$0xff] %v500_v61  ;;  %509 = vst [vmem:[%s242_s7 + $0x18] sm:$0xff] %v501_v62  ;;  %v498_v3 = vmul.f32 %v481_v63, %v983_v8  ;;  %v499_v7 = vmul.f32 %v481_v63, %v985_v9 }
 0x2f7   : > { %506 = vst [vmem:[%s242_s7] sm:$0xff] %v498_v3  ;;  %507 = vst [vmem:[%s242_s7 + $0x8] sm:$0xff] %v499_v7 }
 0x2f8   : > { %v491_v10 = vpop.permute.xlu1 %490 }
 0x2f9   : > { %v502_v11 = vmul.f32 %v491_v10, %v971_v2  ;;  %v503_v5 = vmul.f32 %v491_v10, %v975_v4 }
 0x2fb   : > { %510 = vst [vmem:[%s242_s7 + $0x20] sm:$0xff] %v502_v11  ;;  %511 = vst [vmem:[%s242_s7 + $0x28] sm:$0xff] %v503_v5 }
 0x2fc   : > { %v496_v6 = vpop.permute.xlu1 %495 }
 0x2fd   : > { %v504_v8 = vmul.f32 %v496_v6, %v967_v0  ;;  %v505_v2 = vmul.f32 %v496_v6, %v969_v1 }
 0x2ff   : > { %512 = vst [vmem:[%s242_s7 + $0x30] sm:$0xff] %v504_v8  ;;  %513 = vst [vmem:[%s242_s7 + $0x38] sm:$0xff] %v505_v2 }
 0x300   : > { %768 = shalt.err (!%p765_p10)
}
 0x301   : > { %s769_s12 = scalar_lea.hbm %s1035_s13, 1024  ;;  %s773_s16 = scalar_lea.hbm %s1085_s5, 2048 }
 0x302   : > { %p770_p0 = scmp.ne.s32.totalorder %s1035_s13, %s769_s12  ;;  %p774_p1 = scmp.lt.s32.totalorder %s1035_s13, %s1085_s5 }
 0x303   : > { %p775_p3 = scmp.lt.s32.totalorder %s773_s16, %s769_s12 }
 0x304   : > { %p771_p2 = pnand %p770_p0, %p1094_p12 }
 0x305   : > { %p776_p6 = por %p775_p3, %p774_p1 }
 0x306   : > { %p772_p9 = pneg %p771_p2 }
 0x308   : > { %p777_p11 = pnand %p776_p6, %p772_p9 }
 0x30a   : > { %780 = shalt.err (!%p777_p11)
}
 0x30b   : > { %s828_s10 = smov 256   ;;  %s829_s25 = smov 16  }
 0x30c   : > { %658 = dma.vmem_to_hbm [thread:$0]  (%p1094_p12), %s1030_s9, 1024, %s1035_s13, %s515_s22, %s828_s10, %s828_s10, %s829_s25  }
 0x30d PF: > { %s543_s11 = sand.u32 1, %s807_s18   ;;  %p1095_p13 = scmp.ne.s32.totalorder %s1091_s6, 0 }
 0x30e   : > { %p1096_p4 = scmp.ge.s32.totalorder %s819_s21, 2  ;;  %s544_s17 = scalar_lea.sflag [#allocation4], %s543_s11 }
 0x310   : > { %p665_p5 = pnand %p1096_p4, %p1095_p13 }
 0x312   : > { %p666_p7 = pneg %p665_p5 }
 0x314   : > { %802 = dma.done.wait (%p666_p7), %s544_s17, 1024  }
 0x315   : > { %804 = vsyncadd (%p666_p7), %s544_s17, 4294966272  ;;  %p18_p8 = scmp.ge.s32.totalorder %s885_s24, 4   ;;  %s1097_s18 = smov %s811_s19 }
 0x316   : > { %s1098_s19 = smov %s815_s20  ;;  %s1099_s20 = smov %s897_s27 }
 0x317   : > { %s1100_s21 = smov %s885_s24  ;;  %20 = sbr.rel (!%p18_p8) target bundleno = 5 (0x5), region = 85 }
 0x31c   :  { %549 = vsyncpa [#allocation3], 1 }
 0x31d   :  { %551 = vsyncpa [#allocation3 + $0x1], 1 }
 0x31e   :  { %552 = vsyncpa [#allocation4], 1 }
 0x31f   :  { %554 = vsyncpa [#allocation4 + $0x1], 1 }

</bundles_post_ra>
